<compile_context>
chip_gen: v7x
topology: tpu7x:2x2x1
jax: 0.10.0
libtpu: 0.0.40
codegen_flags: <defaults>
</compile_context>

<pallas_src>
import jax
import jax.numpy as jnp
from jax import lax
from jax.experimental import pallas as pl
from jax.experimental.pallas import tpu as pltpu


def _pick_band_rows(h, w):
    """Largest divisor of h with band_rows * w around ~1k (fat matmul M, modest VMEM)."""
    cap = max(1, min(h, 1024 // max(1, w)))
    for d in range(cap, 0, -1):
        if h % d == 0:
            return d
    return 1


def _collapse_phase_weights(w_hwio):
    """(3,3,Cin,Cout) -> (16,Cin,Cout) phase weights.

    Nearest-2x upsample followed by 3x3/pad-1 conv is, for each output parity phase
    (p, q) in {0,1}^2, exactly a 2x2 conv on the ORIGINAL image whose taps are sums of the
    3x3 taps.  Index layout: idx = ((p*2 + q)*2 + a)*2 + b, tap at original-resolution
    offset (row = p + a - 1, col = q + b - 1).
    """
    groups = (((0,), (1, 2)), ((0, 1), (2,)))
    taps = []
    for p in range(2):
        for q in range(2):
            for a in range(2):
                for b in range(2):
                    acc = None
                    for kh in groups[p][a]:
                        for kw in groups[q][b]:
                            t = w_hwio[kh, kw]
                            acc = t if acc is None else acc + t
                    taps.append(acc)
    return jnp.stack(taps, axis=0)


def _fused_upsample_conv_kernel(cur_ref, top_ref, bot_ref, w_ref, b_ref, o_ref, xs_ref):
    # cur_ref: (1, TH, W, Cin)      current input row band
    # top_ref: (1, 1,  W, Cin)      last row of previous band (clamped at top edge)
    # bot_ref: (1, 1,  W, Cin)      first row of next band (clamped at bottom edge)
    # w_ref:   (16, Cin, Cout)      collapsed phase weights
    # b_ref:   (1, Cout)
    # o_ref:   (1, 2*TH, W, 2*Cout) H fully interleaved; W-phase packed on the lane dim
    # xs_ref:  VMEM (TH+2, W+2, Cin) zero-padded original-resolution band
    th = cur_ref.shape[1]
    wd = cur_ref.shape[2]
    cin = cur_ref.shape[3]
    cout = b_ref.shape[1]
    band = pl.program_id(1)
    nbands = pl.num_programs(1)

    # ---- assemble the zero-padded band in VMEM ('same' padding never touches HBM) ----
    xs_ref[...] = jnp.zeros_like(xs_ref)
    xs_ref[1:th + 1, 1:wd + 1, :] = cur_ref[0]

    @pl.when(band > 0)
    def _():
        xs_ref[0, 1:wd + 1, :] = top_ref[0, 0]           # top halo row (zero at image edge)

    @pl.when(band < nbands - 1)
    def _():
        xs_ref[th + 1, 1:wd + 1, :] = bot_ref[0, 0]      # bottom halo row (zero at image edge)

    # ---- three column-shifted, row-flattened views (pure data movement, no MXU copy) ----
    shifted = []
    for s in range(3):
        v = xs_ref[:, s:s + wd, :]                       # (TH+2, W, Cin)
        shifted.append(v.reshape((th + 2) * wd, cin))    # W % 8 == 0 -> layout-trivial merge

    bias = b_ref[...]                                    # (1, Cout)
    halves = []
    for p in range(2):                                   # output row parity
        phase_q = []
        for q in range(2):                               # output col parity
            acc = jnp.zeros((th * wd, cout), jnp.float32)
            for a in range(2):                           # collapsed 2x2 taps
                for b in range(2):
                    lhs = shifted[q + b][(p + a) * wd:(p + a + th) * wd]   # (TH*W, Cin)
                    idx = ((p * 2 + q) * 2 + a) * 2 + b
                    acc = acc + jnp.dot(lhs, w_ref[idx],
                                        preferred_element_type=jnp.float32)
            phase_q.append(acc + bias)
        rp = jnp.concatenate(phase_q, axis=-1)           # (TH*W, 2*Cout): lanes = [q=0 | q=1]
        halves.append(rp.reshape(th, 1, wd, 2 * cout))
    out = jnp.concatenate(halves, axis=1)                # (TH, 2, W, 2*Cout): dim1 = p
    o_ref[0] = out.reshape(2 * th, wd, 2 * cout).astype(o_ref.dtype)


def _upsample2x_pack_kernel(x_ref, o_ref):
    # x_ref: (1, TH, W, C) -> o_ref: (1, 2*TH, W, 2*C)  (phase-packed; see wrapper reshape)
    xv = x_ref[0]
    th, wd, c = xv.shape
    xc = jnp.concatenate([xv, xv], axis=-1)                       # duplicate for the 2 W phases
    dup = jnp.concatenate([xc[:, None], xc[:, None]], axis=1)     # duplicate for the 2 H phases
    o_ref[0] = dup.reshape(2 * th, wd, 2 * c).astype(o_ref.dtype)


def _upsample_conv2x_nhwc(x_nhwc, w_hwio, bias, band_rows=None):
    n, h, wd, cin = x_nhwc.shape
    cout = w_hwio.shape[-1]
    if wd % 8 != 0:
        # TODO(synk): support widths not a multiple of the 8-sublane tile (needs per-row
        # matmuls or width padding); not needed for typical diffusion feature maps.
        raise NotImplementedError("width must be a multiple of 8")
    th = band_rows if band_rows is not None else _pick_band_rows(h, wd)
    assert h % th == 0, (h, th)
    nbands = h // th
    wp = _collapse_phase_weights(w_hwio)                 # (16, Cin, Cout), tiny host-side prep
    b2 = bias.reshape(1, cout)

    return pl.pallas_call(
        _fused_upsample_conv_kernel,
        out_shape=jax.ShapeDtypeStruct((n, 2 * h, wd, 2 * cout), x_nhwc.dtype),
        grid=(n, nbands),
        in_specs=[
            pl.BlockSpec((1, th, wd, cin), lambda i, b: (i, b, 0, 0)),
            # 1-row halos: block size 1 along H, so the returned index is an element index.
            pl.BlockSpec((1, 1, wd, cin),
                         lambda i, b: (i, jnp.maximum(b * th - 1, 0), 0, 0)),
            pl.BlockSpec((1, 1, wd, cin),
                         lambda i, b: (i, jnp.minimum((b + 1) * th, h - 1), 0, 0)),
            pl.BlockSpec((16, cin, cout), lambda i, b: (0, 0, 0)),
            pl.BlockSpec((1, cout), lambda i, b: (0, 0)),
        ],
        out_specs=pl.BlockSpec((1, 2 * th, wd, 2 * cout), lambda i, b: (i, b, 0, 0)),
        scratch_shapes=[pltpu.VMEM((th + 2, wd + 2, cin), x_nhwc.dtype)],
        compiler_params=pltpu.CompilerParams(
            dimension_semantics=("parallel", "parallel")),
    )(x_nhwc, x_nhwc, x_nhwc, wp, b2)


def _upsample2x_nhwc(x_nhwc, band_rows=None):
    n, h, wd, c = x_nhwc.shape
    th = band_rows if band_rows is not None else _pick_band_rows(h, wd)
    assert h % th == 0, (h, th)
    return pl.pallas_call(
        _upsample2x_pack_kernel,
        out_shape=jax.ShapeDtypeStruct((n, 2 * h, wd, 2 * c), x_nhwc.dtype),
        grid=(n, h // th),
        in_specs=[pl.BlockSpec((1, th, wd, c), lambda i, b: (i, b, 0, 0))],
        out_specs=pl.BlockSpec((1, 2 * th, wd, 2 * c), lambda i, b: (i, b, 0, 0)),
        compiler_params=pltpu.CompilerParams(
            dimension_semantics=("parallel", "parallel")),
    )(x_nhwc)


def upsample_forward(x_nchw, conv_weight_oihw=None, conv_bias=None, use_conv=True,
                     band_rows=None):
    """Pallas equivalent of Upsample.forward: NCHW in -> NCHW out."""
    n, c, h, wd = x_nchw.shape
    # NCHW <-> NHWC relayouts are interface glue for the PyTorch NCHW contract.
    # TODO(synk): keep the surrounding model in NHWC to drop these two transposes.
    x = jnp.transpose(x_nchw, (0, 2, 3, 1))
    if use_conv:
        w_hwio = jnp.transpose(conv_weight_oihw, (2, 3, 1, 0))   # OIHW -> HWIO (tiny)
        packed = _upsample_conv2x_nhwc(x, w_hwio, conv_bias, band_rows)
        cout = conv_weight_oihw.shape[0]
    else:
        packed = _upsample2x_nhwc(x, band_rows)
        cout = c
    # (N, 2H, W, 2*C) -> (N, 2H, 2W, C): adjacent row-major dims merge -> free reshape.
    out_nhwc = packed.reshape(n, 2 * h, 2 * wd, cout)
    return jnp.transpose(out_nhwc, (0, 3, 1, 2))


def _reference(x_nchw, w=None, b=None, use_conv=True):
    up = jnp.repeat(jnp.repeat(x_nchw, 2, axis=2), 2, axis=3)
    if not use_conv:
        return up
    out = lax.conv_general_dilated(
        up, w, window_strides=(1, 1), padding=((1, 1), (1, 1)),
        dimension_numbers=("NCHW", "OIHW", "NCHW"))
    return out + b[None, :, None, None]


if __name__ == "__main__":
    key = jax.random.PRNGKey(0)
    kx, kw, kb = jax.random.split(key, 3)
    N, C, H, W = 2, 4, 16, 16
    x = jax.random.normal(kx, (N, C, H, W), jnp.float32)
    # nn.Conv2d(channels, channels, 3, padding=1) parameter shapes.
    w = jax.random.normal(kw, (C, C, 3, 3), jnp.float32) * 0.1   # (O, I, kH, kW)
    b = jax.random.normal(kb, (C,), jnp.float32) * 0.1

    ref = _reference(x, w, b, use_conv=True)

    # conv path, multiple row bands (exercises halo rows + boundary zero padding)
    out = jax.block_until_ready(upsample_forward(x, w, b, use_conv=True, band_rows=4))
    assert out.shape == (N, C, 2 * H, 2 * W)
    assert jnp.allclose(out, ref, atol=1e-4, rtol=1e-4), float(jnp.max(jnp.abs(out - ref)))

    # conv path, auto band size (single band per image)
    out = jax.block_until_ready(upsample_forward(x, w, b, use_conv=True))
    assert jnp.allclose(out, ref, atol=1e-4, rtol=1e-4), float(jnp.max(jnp.abs(out - ref)))

    # upsample-only path
    out = jax.block_until_ready(upsample_forward(x, use_conv=False, band_rows=8))
    assert jnp.allclose(out, _reference(x, use_conv=False))

    # lane-dense channel count (the layout the kernel is actually tuned for)
    k2x, k2w, k2b = jax.random.split(jax.random.PRNGKey(1), 3)
    C2, H2, W2 = 128, 8, 8
    x2 = jax.random.normal(k2x, (1, C2, H2, W2), jnp.float32)
    w2 = jax.random.normal(k2w, (C2, C2, 3, 3), jnp.float32) * 0.05
    b2 = jax.random.normal(k2b, (C2,), jnp.float32) * 0.05
    out2 = jax.block_until_ready(upsample_forward(x2, w2, b2, use_conv=True, band_rows=4))
    ref2 = _reference(x2, w2, b2, use_conv=True)
    assert jnp.allclose(out2, ref2, atol=2e-4, rtol=2e-4), float(jnp.max(jnp.abs(out2 - ref2)))

    print("KERNEL_OK")
</pallas_src>

<mosaic_0001>
module attributes {stable_mosaic.version = 11 : i64} {
  func.func @_fused_upsample_conv_kernel(%arg0: i32, %arg1: i32, %arg2: memref<1x4x16x4xf32, #tpu.memory_space<vmem>>, %arg3: memref<1x1x16x4xf32, #tpu.memory_space<vmem>>, %arg4: memref<1x1x16x4xf32, #tpu.memory_space<vmem>>, %arg5: memref<16x4x4xf32, #tpu.memory_space<vmem>>, %arg6: memref<1x4xf32, #tpu.memory_space<vmem>>, %arg7: memref<1x8x16x8xf32, #tpu.memory_space<vmem>>, %arg8: memref<6x18x4xf32, #tpu.memory_space<vmem>>) attributes {dimension_semantics = [#tpu.dimension_semantics<parallel>, #tpu.dimension_semantics<parallel>], iteration_bounds = array<i64: 2, 4>, scalar_prefetch = 0 : i64, scratch_operands = 1 : i64, tpu.core_type = #tpu.core_type<tc>, window_params = [{transform_indices = @transform_0, window_bounds = array<i64: 1, 4, 16, 4>}, {transform_indices = @transform_1, window_bounds = array<i64: 1, 1, 16, 4>}, {transform_indices = @transform_2, window_bounds = array<i64: 1, 1, 16, 4>}, {pipeline_mode = #tpu.pipeline_mode<synchronous>, transform_indices = @transform_3, window_bounds = array<i64: 16, 4, 4>}, {pipeline_mode = #tpu.pipeline_mode<synchronous>, transform_indices = @transform_4, window_bounds = array<i64: 1, 4>}, {transform_indices = @transform_5, window_bounds = array<i64: 1, 8, 16, 8>}]} {
    %cst = arith.constant 0.000000e+00 : f32
    %0 = vector.broadcast %cst : f32 to vector<6x18x4xf32>
    %c0 = arith.constant 0 : index
    %c0_0 = arith.constant 0 : index
    %c0_1 = arith.constant 0 : index
    %1 = vector.load %arg8[%c0, %c0_0, %c0_1] : memref<6x18x4xf32, #tpu.memory_space<vmem>>, vector<6x18x4xf32>
    tpu.vector_store %arg8[%c0, %c0_0, %c0_1], %0 {strides = array<i32>} : memref<6x18x4xf32, #tpu.memory_space<vmem>>, vector<6x18x4xf32>,
    %c0_2 = arith.constant 0 : index
    %c0_3 = arith.constant 0 : index
    %c0_4 = arith.constant 0 : index
    %c0_5 = arith.constant 0 : index
    %2 = vector.load %arg2[%c0_2, %c0_3, %c0_4, %c0_5] : memref<1x4x16x4xf32, #tpu.memory_space<vmem>>, vector<1x4x16x4xf32>
    %3 = vector.shape_cast %2 : vector<1x4x16x4xf32> to vector<4x16x4xf32>
    %c1 = arith.constant 1 : index
    %c1_6 = arith.constant 1 : index
    %c0_7 = arith.constant 0 : index
    %4 = vector.load %arg8[%c1, %c1_6, %c0_7] : memref<6x18x4xf32, #tpu.memory_space<vmem>>, vector<4x16x4xf32>
    tpu.vector_store %arg8[%c1, %c1_6, %c0_7], %3 {strides = array<i32>} : memref<6x18x4xf32, #tpu.memory_space<vmem>>, vector<4x16x4xf32>,
    %c0_i32 = arith.constant 0 : i32
    %5 = arith.cmpi sgt, %arg1, %c0_i32 : i32
    %6 = arith.extui %5 : i1 to i32
    %c0_i32_8 = arith.constant 0 : i32
    %7 = arith.cmpi ne, %6, %c0_i32_8 : i32
    scf.if %7 {
      %c0_79 = arith.constant 0 : index
      %c0_80 = arith.constant 0 : index
      %c0_81 = arith.constant 0 : index
      %c0_82 = arith.constant 0 : index
      %119 = vector.load %arg3[%c0_79, %c0_80, %c0_81, %c0_82] : memref<1x1x16x4xf32, #tpu.memory_space<vmem>>, vector<1x1x16x4xf32>
      %120 = vector.shape_cast %119 : vector<1x1x16x4xf32> to vector<16x4xf32>
      %c0_83 = arith.constant 0 : index
      %c1_84 = arith.constant 1 : index
      %c0_85 = arith.constant 0 : index
      %121 = vector.load %arg8[%c0_83, %c1_84, %c0_85] : memref<6x18x4xf32, #tpu.memory_space<vmem>>, vector<1x16x4xf32>
      %122 = vector.shape_cast %121 : vector<1x16x4xf32> to vector<16x4xf32>
      %123 = vector.shape_cast %120 : vector<16x4xf32> to vector<1x16x4xf32>
      tpu.vector_store %arg8[%c0_83, %c1_84, %c0_85], %123 {strides = array<i32>} : memref<6x18x4xf32, #tpu.memory_space<vmem>>, vector<1x16x4xf32>,
    } else {
    }
    %c3_i32 = arith.constant 3 : i32
    %8 = arith.cmpi slt, %arg1, %c3_i32 : i32
    %9 = arith.extui %8 : i1 to i32
    %c0_i32_9 = arith.constant 0 : i32
    %10 = arith.cmpi ne, %9, %c0_i32_9 : i32
    scf.if %10 {
      %c0_79 = arith.constant 0 : index
      %c0_80 = arith.constant 0 : index
      %c0_81 = arith.constant 0 : index
      %c0_82 = arith.constant 0 : index
      %119 = vector.load %arg4[%c0_79, %c0_80, %c0_81, %c0_82] : memref<1x1x16x4xf32, #tpu.memory_space<vmem>>, vector<1x1x16x4xf32>
      %120 = vector.shape_cast %119 : vector<1x1x16x4xf32> to vector<16x4xf32>
      %c5_83 = arith.constant 5 : index
      %c1_84 = arith.constant 1 : index
      %c0_85 = arith.constant 0 : index
      %121 = vector.load %arg8[%c5_83, %c1_84, %c0_85] : memref<6x18x4xf32, #tpu.memory_space<vmem>>, vector<1x16x4xf32>
      %122 = vector.shape_cast %121 : vector<1x16x4xf32> to vector<16x4xf32>
      %123 = vector.shape_cast %120 : vector<16x4xf32> to vector<1x16x4xf32>
      tpu.vector_store %arg8[%c5_83, %c1_84, %c0_85], %123 {strides = array<i32>} : memref<6x18x4xf32, #tpu.memory_space<vmem>>, vector<1x16x4xf32>,
    } else {
    }
    %c0_10 = arith.constant 0 : index
    %c0_11 = arith.constant 0 : index
    %c0_12 = arith.constant 0 : index
    %11 = vector.load %arg8[%c0_10, %c0_11, %c0_12] : memref<6x18x4xf32, #tpu.memory_space<vmem>>, vector<6x16x4xf32>
    %12 = vector.shape_cast %11 : vector<6x16x4xf32> to vector<96x4xf32>
    %c0_13 = arith.constant 0 : index
    %c1_14 = arith.constant 1 : index
    %c0_15 = arith.constant 0 : index
    %13 = vector.load %arg8[%c0_13, %c1_14, %c0_15] : memref<6x18x4xf32, #tpu.memory_space<vmem>>, vector<6x16x4xf32>
    %14 = vector.shape_cast %13 : vector<6x16x4xf32> to vector<96x4xf32>
    %c0_16 = arith.constant 0 : index
    %c2 = arith.constant 2 : index
    %c0_17 = arith.constant 0 : index
    %15 = vector.load %arg8[%c0_16, %c2, %c0_17] : memref<6x18x4xf32, #tpu.memory_space<vmem>>, vector<6x16x4xf32>
    %16 = vector.shape_cast %15 : vector<6x16x4xf32> to vector<96x4xf32>
    %c0_18 = arith.constant 0 : index
    %c0_19 = arith.constant 0 : index
    %17 = vector.load %arg6[%c0_18, %c0_19] : memref<1x4xf32, #tpu.memory_space<vmem>>, vector<1x4xf32>
    %cst_20 = arith.constant 0.000000e+00 : f32
    %18 = vector.broadcast %cst_20 : f32 to vector<64x4xf32>
    %19 = vector.extract_strided_slice %12 {offsets = [0, 0], sizes = [64, 4], strides = [1, 1]} : vector<96x4xf32> to vector<64x4xf32>
    %c0_21 = arith.constant 0 : index
    %c0_22 = arith.constant 0 : index
    %c0_23 = arith.constant 0 : index
    %20 = vector.load %arg5[%c0_21, %c0_22, %c0_23] : memref<16x4x4xf32, #tpu.memory_space<vmem>>, vector<1x4x4xf32>
    %21 = vector.shape_cast %20 : vector<1x4x4xf32> to vector<4x4xf32>
    %cst_24 = arith.constant dense<0.000000e+00> : vector<64x4xf32>
    %22 = tpu.matmul %19, %21, %cst_24 {dimension_numbers = #tpu.dot_dimension_numbers<[1], [0], [0], [1], [0, 0, 1, 1], [], []>} : vector<64x4xf32>, vector<4x4xf32>, vector<64x4xf32> -> vector<64x4xf32>
    %23 = arith.addf %18, %22 : vector<64x4xf32>
    %24 = vector.extract_strided_slice %14 {offsets = [0, 0], sizes = [64, 4], strides = [1, 1]} : vector<96x4xf32> to vector<64x4xf32>
    %c1_25 = arith.constant 1 : index
    %c0_26 = arith.constant 0 : index
    %c0_27 = arith.constant 0 : index
    %25 = vector.load %arg5[%c1_25, %c0_26, %c0_27] : memref<16x4x4xf32, #tpu.memory_space<vmem>>, vector<1x4x4xf32>
    %26 = vector.shape_cast %25 : vector<1x4x4xf32> to vector<4x4xf32>
    %cst_28 = arith.constant dense<0.000000e+00> : vector<64x4xf32>
    %27 = tpu.matmul %24, %26, %cst_28 {dimension_numbers = #tpu.dot_dimension_numbers<[1], [0], [0], [1], [0, 0, 1, 1], [], []>} : vector<64x4xf32>, vector<4x4xf32>, vector<64x4xf32> -> vector<64x4xf32>
    %28 = arith.addf %23, %27 : vector<64x4xf32>
    %29 = vector.extract_strided_slice %12 {offsets = [16, 0], sizes = [64, 4], strides = [1, 1]} : vector<96x4xf32> to vector<64x4xf32>
    %c2_29 = arith.constant 2 : index
    %c0_30 = arith.constant 0 : index
    %c0_31 = arith.constant 0 : index
    %30 = vector.load %arg5[%c2_29, %c0_30, %c0_31] : memref<16x4x4xf32, #tpu.memory_space<vmem>>, vector<1x4x4xf32>
    %31 = vector.shape_cast %30 : vector<1x4x4xf32> to vector<4x4xf32>
    %cst_32 = arith.constant dense<0.000000e+00> : vector<64x4xf32>
    %32 = tpu.matmul %29, %31, %cst_32 {dimension_numbers = #tpu.dot_dimension_numbers<[1], [0], [0], [1], [0, 0, 1, 1], [], []>} : vector<64x4xf32>, vector<4x4xf32>, vector<64x4xf32> -> vector<64x4xf32>
    %33 = arith.addf %28, %32 : vector<64x4xf32>
    %34 = vector.extract_strided_slice %14 {offsets = [16, 0], sizes = [64, 4], strides = [1, 1]} : vector<96x4xf32> to vector<64x4xf32>
    %c3 = arith.constant 3 : index
    %c0_33 = arith.constant 0 : index
    %c0_34 = arith.constant 0 : index
    %35 = vector.load %arg5[%c3, %c0_33, %c0_34] : memref<16x4x4xf32, #tpu.memory_space<vmem>>, vector<1x4x4xf32>
    %36 = vector.shape_cast %35 : vector<1x4x4xf32> to vector<4x4xf32>
    %cst_35 = arith.constant dense<0.000000e+00> : vector<64x4xf32>
    %37 = tpu.matmul %34, %36, %cst_35 {dimension_numbers = #tpu.dot_dimension_numbers<[1], [0], [0], [1], [0, 0, 1, 1], [], []>} : vector<64x4xf32>, vector<4x4xf32>, vector<64x4xf32> -> vector<64x4xf32>
    %38 = arith.addf %33, %37 : vector<64x4xf32>
    %39 = vector.broadcast %17 : vector<1x4xf32> to vector<64x4xf32>
    %40 = arith.addf %38, %39 : vector<64x4xf32>
    %cst_36 = arith.constant 0.000000e+00 : f32
    %41 = vector.broadcast %cst_36 : f32 to vector<64x4xf32>
    %42 = vector.extract_strided_slice %14 {offsets = [0, 0], sizes = [64, 4], strides = [1, 1]} : vector<96x4xf32> to vector<64x4xf32>
    %c4 = arith.constant 4 : index
    %c0_37 = arith.constant 0 : index
    %c0_38 = arith.constant 0 : index
    %43 = vector.load %arg5[%c4, %c0_37, %c0_38] : memref<16x4x4xf32, #tpu.memory_space<vmem>>, vector<1x4x4xf32>
    %44 = vector.shape_cast %43 : vector<1x4x4xf32> to vector<4x4xf32>
    %cst_39 = arith.constant dense<0.000000e+00> : vector<64x4xf32>
    %45 = tpu.matmul %42, %44, %cst_39 {dimension_numbers = #tpu.dot_dimension_numbers<[1], [0], [0], [1], [0, 0, 1, 1], [], []>} : vector<64x4xf32>, vector<4x4xf32>, vector<64x4xf32> -> vector<64x4xf32>
    %46 = arith.addf %41, %45 : vector<64x4xf32>
    %47 = vector.extract_strided_slice %16 {offsets = [0, 0], sizes = [64, 4], strides = [1, 1]} : vector<96x4xf32> to vector<64x4xf32>
    %c5 = arith.constant 5 : index
    %c0_40 = arith.constant 0 : index
    %c0_41 = arith.constant 0 : index
    %48 = vector.load %arg5[%c5, %c0_40, %c0_41] : memref<16x4x4xf32, #tpu.memory_space<vmem>>, vector<1x4x4xf32>
    %49 = vector.shape_cast %48 : vector<1x4x4xf32> to vector<4x4xf32>
    %cst_42 = arith.constant dense<0.000000e+00> : vector<64x4xf32>
    %50 = tpu.matmul %47, %49, %cst_42 {dimension_numbers = #tpu.dot_dimension_numbers<[1], [0], [0], [1], [0, 0, 1, 1], [], []>} : vector<64x4xf32>, vector<4x4xf32>, vector<64x4xf32> -> vector<64x4xf32>
    %51 = arith.addf %46, %50 : vector<64x4xf32>
    %52 = vector.extract_strided_slice %14 {offsets = [16, 0], sizes = [64, 4], strides = [1, 1]} : vector<96x4xf32> to vector<64x4xf32>
    %c6 = arith.constant 6 : index
    %c0_43 = arith.constant 0 : index
    %c0_44 = arith.constant 0 : index
    %53 = vector.load %arg5[%c6, %c0_43, %c0_44] : memref<16x4x4xf32, #tpu.memory_space<vmem>>, vector<1x4x4xf32>
    %54 = vector.shape_cast %53 : vector<1x4x4xf32> to vector<4x4xf32>
    %cst_45 = arith.constant dense<0.000000e+00> : vector<64x4xf32>
    %55 = tpu.matmul %52, %54, %cst_45 {dimension_numbers = #tpu.dot_dimension_numbers<[1], [0], [0], [1], [0, 0, 1, 1], [], []>} : vector<64x4xf32>, vector<4x4xf32>, vector<64x4xf32> -> vector<64x4xf32>
    %56 = arith.addf %51, %55 : vector<64x4xf32>
    %57 = vector.extract_strided_slice %16 {offsets = [16, 0], sizes = [64, 4], strides = [1, 1]} : vector<96x4xf32> to vector<64x4xf32>
    %c7 = arith.constant 7 : index
    %c0_46 = arith.constant 0 : index
    %c0_47 = arith.constant 0 : index
    %58 = vector.load %arg5[%c7, %c0_46, %c0_47] : memref<16x4x4xf32, #tpu.memory_space<vmem>>, vector<1x4x4xf32>
    %59 = vector.shape_cast %58 : vector<1x4x4xf32> to vector<4x4xf32>
    %cst_48 = arith.constant dense<0.000000e+00> : vector<64x4xf32>
    %60 = tpu.matmul %57, %59, %cst_48 {dimension_numbers = #tpu.dot_dimension_numbers<[1], [0], [0], [1], [0, 0, 1, 1], [], []>} : vector<64x4xf32>, vector<4x4xf32>, vector<64x4xf32> -> vector<64x4xf32>
    %61 = arith.addf %56, %60 : vector<64x4xf32>
    %62 = vector.broadcast %17 : vector<1x4xf32> to vector<64x4xf32>
    %63 = arith.addf %61, %62 : vector<64x4xf32>
    %64 = tpu.concatenate %40, %63 in 1 : vector<64x4xf32>, vector<64x4xf32> -> vector<64x8xf32>
    %65 = vector.shape_cast %64 : vector<64x8xf32> to vector<4x1x16x8xf32>
    %cst_49 = arith.constant 0.000000e+00 : f32
    %66 = vector.broadcast %cst_49 : f32 to vector<64x4xf32>
    %67 = vector.extract_strided_slice %12 {offsets = [16, 0], sizes = [64, 4], strides = [1, 1]} : vector<96x4xf32> to vector<64x4xf32>
    %c8 = arith.constant 8 : index
    %c0_50 = arith.constant 0 : index
    %c0_51 = arith.constant 0 : index
    %68 = vector.load %arg5[%c8, %c0_50, %c0_51] : memref<16x4x4xf32, #tpu.memory_space<vmem>>, vector<1x4x4xf32>
    %69 = vector.shape_cast %68 : vector<1x4x4xf32> to vector<4x4xf32>
    %cst_52 = arith.constant dense<0.000000e+00> : vector<64x4xf32>
    %70 = tpu.matmul %67, %69, %cst_52 {dimension_numbers = #tpu.dot_dimension_numbers<[1], [0], [0], [1], [0, 0, 1, 1], [], []>} : vector<64x4xf32>, vector<4x4xf32>, vector<64x4xf32> -> vector<64x4xf32>
    %71 = arith.addf %66, %70 : vector<64x4xf32>
    %72 = vector.extract_strided_slice %14 {offsets = [16, 0], sizes = [64, 4], strides = [1, 1]} : vector<96x4xf32> to vector<64x4xf32>
    %c9 = arith.constant 9 : index
    %c0_53 = arith.constant 0 : index
    %c0_54 = arith.constant 0 : index
    %73 = vector.load %arg5[%c9, %c0_53, %c0_54] : memref<16x4x4xf32, #tpu.memory_space<vmem>>, vector<1x4x4xf32>
    %74 = vector.shape_cast %73 : vector<1x4x4xf32> to vector<4x4xf32>
    %cst_55 = arith.constant dense<0.000000e+00> : vector<64x4xf32>
    %75 = tpu.matmul %72, %74, %cst_55 {dimension_numbers = #tpu.dot_dimension_numbers<[1], [0], [0], [1], [0, 0, 1, 1], [], []>} : vector<64x4xf32>, vector<4x4xf32>, vector<64x4xf32> -> vector<64x4xf32>
    %76 = arith.addf %71, %75 : vector<64x4xf32>
    %77 = vector.extract_strided_slice %12 {offsets = [32, 0], sizes = [64, 4], strides = [1, 1]} : vector<96x4xf32> to vector<64x4xf32>
    %c10 = arith.constant 10 : index
    %c0_56 = arith.constant 0 : index
    %c0_57 = arith.constant 0 : index
    %78 = vector.load %arg5[%c10, %c0_56, %c0_57] : memref<16x4x4xf32, #tpu.memory_space<vmem>>, vector<1x4x4xf32>
    %79 = vector.shape_cast %78 : vector<1x4x4xf32> to vector<4x4xf32>
    %cst_58 = arith.constant dense<0.000000e+00> : vector<64x4xf32>
    %80 = tpu.matmul %77, %79, %cst_58 {dimension_numbers = #tpu.dot_dimension_numbers<[1], [0], [0], [1], [0, 0, 1, 1], [], []>} : vector<64x4xf32>, vector<4x4xf32>, vector<64x4xf32> -> vector<64x4xf32>
    %81 = arith.addf %76, %80 : vector<64x4xf32>
    %82 = vector.extract_strided_slice %14 {offsets = [32, 0], sizes = [64, 4], strides = [1, 1]} : vector<96x4xf32> to vector<64x4xf32>
    %c11 = arith.constant 11 : index
    %c0_59 = arith.constant 0 : index
    %c0_60 = arith.constant 0 : index
    %83 = vector.load %arg5[%c11, %c0_59, %c0_60] : memref<16x4x4xf32, #tpu.memory_space<vmem>>, vector<1x4x4xf32>
    %84 = vector.shape_cast %83 : vector<1x4x4xf32> to vector<4x4xf32>
    %cst_61 = arith.constant dense<0.000000e+00> : vector<64x4xf32>
    %85 = tpu.matmul %82, %84, %cst_61 {dimension_numbers = #tpu.dot_dimension_numbers<[1], [0], [0], [1], [0, 0, 1, 1], [], []>} : vector<64x4xf32>, vector<4x4xf32>, vector<64x4xf32> -> vector<64x4xf32>
    %86 = arith.addf %81, %85 : vector<64x4xf32>
    %87 = vector.broadcast %17 : vector<1x4xf32> to vector<64x4xf32>
    %88 = arith.addf %86, %87 : vector<64x4xf32>
    %cst_62 = arith.constant 0.000000e+00 : f32
    %89 = vector.broadcast %cst_62 : f32 to vector<64x4xf32>
    %90 = vector.extract_strided_slice %14 {offsets = [16, 0], sizes = [64, 4], strides = [1, 1]} : vector<96x4xf32> to vector<64x4xf32>
    %c12 = arith.constant 12 : index
    %c0_63 = arith.constant 0 : index
    %c0_64 = arith.constant 0 : index
    %91 = vector.load %arg5[%c12, %c0_63, %c0_64] : memref<16x4x4xf32, #tpu.memory_space<vmem>>, vector<1x4x4xf32>
    %92 = vector.shape_cast %91 : vector<1x4x4xf32> to vector<4x4xf32>
    %cst_65 = arith.constant dense<0.000000e+00> : vector<64x4xf32>
    %93 = tpu.matmul %90, %92, %cst_65 {dimension_numbers = #tpu.dot_dimension_numbers<[1], [0], [0], [1], [0, 0, 1, 1], [], []>} : vector<64x4xf32>, vector<4x4xf32>, vector<64x4xf32> -> vector<64x4xf32>
    %94 = arith.addf %89, %93 : vector<64x4xf32>
    %95 = vector.extract_strided_slice %16 {offsets = [16, 0], sizes = [64, 4], strides = [1, 1]} : vector<96x4xf32> to vector<64x4xf32>
    %c13 = arith.constant 13 : index
    %c0_66 = arith.constant 0 : index
    %c0_67 = arith.constant 0 : index
    %96 = vector.load %arg5[%c13, %c0_66, %c0_67] : memref<16x4x4xf32, #tpu.memory_space<vmem>>, vector<1x4x4xf32>
    %97 = vector.shape_cast %96 : vector<1x4x4xf32> to vector<4x4xf32>
    %cst_68 = arith.constant dense<0.000000e+00> : vector<64x4xf32>
    %98 = tpu.matmul %95, %97, %cst_68 {dimension_numbers = #tpu.dot_dimension_numbers<[1], [0], [0], [1], [0, 0, 1, 1], [], []>} : vector<64x4xf32>, vector<4x4xf32>, vector<64x4xf32> -> vector<64x4xf32>
    %99 = arith.addf %94, %98 : vector<64x4xf32>
    %100 = vector.extract_strided_slice %14 {offsets = [32, 0], sizes = [64, 4], strides = [1, 1]} : vector<96x4xf32> to vector<64x4xf32>
    %c14 = arith.constant 14 : index
    %c0_69 = arith.constant 0 : index
    %c0_70 = arith.constant 0 : index
    %101 = vector.load %arg5[%c14, %c0_69, %c0_70] : memref<16x4x4xf32, #tpu.memory_space<vmem>>, vector<1x4x4xf32>
    %102 = vector.shape_cast %101 : vector<1x4x4xf32> to vector<4x4xf32>
    %cst_71 = arith.constant dense<0.000000e+00> : vector<64x4xf32>
    %103 = tpu.matmul %100, %102, %cst_71 {dimension_numbers = #tpu.dot_dimension_numbers<[1], [0], [0], [1], [0, 0, 1, 1], [], []>} : vector<64x4xf32>, vector<4x4xf32>, vector<64x4xf32> -> vector<64x4xf32>
    %104 = arith.addf %99, %103 : vector<64x4xf32>
    %105 = vector.extract_strided_slice %16 {offsets = [32, 0], sizes = [64, 4], strides = [1, 1]} : vector<96x4xf32> to vector<64x4xf32>
    %c15 = arith.constant 15 : index
    %c0_72 = arith.constant 0 : index
    %c0_73 = arith.constant 0 : index
    %106 = vector.load %arg5[%c15, %c0_72, %c0_73] : memref<16x4x4xf32, #tpu.memory_space<vmem>>, vector<1x4x4xf32>
    %107 = vector.shape_cast %106 : vector<1x4x4xf32> to vector<4x4xf32>
    %cst_74 = arith.constant dense<0.000000e+00> : vector<64x4xf32>
    %108 = tpu.matmul %105, %107, %cst_74 {dimension_numbers = #tpu.dot_dimension_numbers<[1], [0], [0], [1], [0, 0, 1, 1], [], []>} : vector<64x4xf32>, vector<4x4xf32>, vector<64x4xf32> -> vector<64x4xf32>
    %109 = arith.addf %104, %108 : vector<64x4xf32>
    %110 = vector.broadcast %17 : vector<1x4xf32> to vector<64x4xf32>
    %111 = arith.addf %109, %110 : vector<64x4xf32>
    %112 = tpu.concatenate %88, %111 in 1 : vector<64x4xf32>, vector<64x4xf32> -> vector<64x8xf32>
    %113 = vector.shape_cast %112 : vector<64x8xf32> to vector<4x1x16x8xf32>
    %114 = tpu.concatenate %65, %113 in 1 : vector<4x1x16x8xf32>, vector<4x1x16x8xf32> -> vector<4x2x16x8xf32>
    %115 = vector.shape_cast %114 : vector<4x2x16x8xf32> to vector<8x16x8xf32>
    %c0_75 = arith.constant 0 : index
    %c0_76 = arith.constant 0 : index
    %c0_77 = arith.constant 0 : index
    %c0_78 = arith.constant 0 : index
    %116 = vector.load %arg7[%c0_75, %c0_76, %c0_77, %c0_78] : memref<1x8x16x8xf32, #tpu.memory_space<vmem>>, vector<1x8x16x8xf32>
    %117 = vector.shape_cast %116 : vector<1x8x16x8xf32> to vector<8x16x8xf32>
    %118 = vector.shape_cast %115 : vector<8x16x8xf32> to vector<1x8x16x8xf32>
    tpu.vector_store %arg7[%c0_75, %c0_76, %c0_77, %c0_78], %118 {strides = array<i32>} : memref<1x8x16x8xf32, #tpu.memory_space<vmem>>, vector<1x8x16x8xf32>,
    return
  }
  func.func @transform_0(%arg0: i32, %arg1: i32) -> (i32, i32, i32, i32) {
    %c0_i32 = arith.constant 0 : i32
    %c0_i32_0 = arith.constant 0 : i32
    %c0_i32_1 = arith.constant 0 : i32
    return %arg0, %arg1, %c0_i32, %c0_i32_0 : i32, i32, i32, i32
  }
  func.func @transform_1(%arg0: i32, %arg1: i32) -> (i32, i32, i32, i32) {
    %c4_i32 = arith.constant 4 : i32
    %0 = arith.muli %arg1, %c4_i32 : i32
    %c1_i32 = arith.constant 1 : i32
    %1 = arith.subi %0, %c1_i32 : i32
    %c0_i32 = arith.constant 0 : i32
    %2 = arith.maxsi %1, %c0_i32 : i32
    %c0_i32_0 = arith.constant 0 : i32
    %c0_i32_1 = arith.constant 0 : i32
    %c0_i32_2 = arith.constant 0 : i32
    return %arg0, %2, %c0_i32_0, %c0_i32_1 : i32, i32, i32, i32
  }
  func.func @transform_2(%arg0: i32, %arg1: i32) -> (i32, i32, i32, i32) {
    %c1_i32 = arith.constant 1 : i32
    %0 = arith.addi %arg1, %c1_i32 : i32
    %c4_i32 = arith.constant 4 : i32
    %1 = arith.muli %0, %c4_i32 : i32
    %c15_i32 = arith.constant 15 : i32
    %2 = arith.minsi %1, %c15_i32 : i32
    %c0_i32 = arith.constant 0 : i32
    %c0_i32_0 = arith.constant 0 : i32
    %c0_i32_1 = arith.constant 0 : i32
    return %arg0, %2, %c0_i32, %c0_i32_0 : i32, i32, i32, i32
  }
  func.func @transform_3(%arg0: i32, %arg1: i32) -> (i32, i32, i32) {
    %c0_i32 = arith.constant 0 : i32
    %c0_i32_0 = arith.constant 0 : i32
    %c0_i32_1 = arith.constant 0 : i32
    %c0_i32_2 = arith.constant 0 : i32
    return %c0_i32, %c0_i32_0, %c0_i32_1 : i32, i32, i32
  }
  func.func @transform_4(%arg0: i32, %arg1: i32) -> (i32, i32) {
    %c0_i32 = arith.constant 0 : i32
    %c0_i32_0 = arith.constant 0 : i32
    %c0_i32_1 = arith.constant 0 : i32
    return %c0_i32, %c0_i32_0 : i32, i32
  }
  func.func @transform_5(%arg0: i32, %arg1: i32) -> (i32, i32, i32, i32) {
    %c0_i32 = arith.constant 0 : i32
    %c0_i32_0 = arith.constant 0 : i32
    %c0_i32_1 = arith.constant 0 : i32
    return %arg0, %arg1, %c0_i32, %c0_i32_0 : i32, i32, i32, i32
  }
}

</mosaic_0001>

<bundles_post_ra>
// kernel: tpu_custom_call.1
= control target key start
LH: loop header
LB: loop body
LE: loop exit
PB: predicated region body
PF: predicated region fallthrough
CT: control target
= control target key end

     0   :  { %s3478_s18 = smov 0   ;;  %s3480_s19 = smov 0   ;;  %s4079_s0 = inlined_call_operand.vmem [shape: f32[2,16,16,4], index: 0, kind: input, shape index: {}]   ;;  %s4080_s1 = inlined_call_operand.vmem [shape: f32[2,16,16,4], index: 1, kind: input, shape index: {}]   ;;  %s4081_s2 = inlined_call_operand.vmem [shape: f32[2,16,16,4], index: 2, kind: input, shape index: {}]   ;;  %s4082_s3 = inlined_call_operand.vmem [shape: f32[16,4,4], index: 3, kind: input, shape index: {}]   ;;  %s4083_s4 = inlined_call_operand.vmem [shape: f32[1,4], index: 4, kind: input, shape index: {}]   ;;  %s4084_s5 = inlined_call_operand.vmem [shape: f32[2,32,16,8], index: 5, kind: output, shape index: {}]  }
   0x1   :  { %4085 = sst [smem:[#allocation4_spill]] %s4079_s0  ;;  %s3482_s20 = smov 0  }
   0x2   :  { %s3484_s21 = smov 0   ;;  %s3486_s22 = smov 0  }
   0x3 LB: > { %s24_s23 = sadd.s32 1, %s3436_s20  ;;  %s27_s24 = sadd.s32 1, %s3440_s21  ;;  %s3444_s22 = sphi %s3486_s22, %s15_s22   ;;  %s3440_s21 = sphi %s3484_s21, %s4093_s21   ;;  %s3436_s20 = sphi %s3482_s20, %s4092_s20   ;;  %s3432_s19 = sphi %s3480_s19, %s4091_s19   ;;  %s3428_s18 = sphi %s3478_s18, %s4090_s18  }
   0x4   : > { %p25_p0 = scmp.ge.s32.totalorder %s24_s23, 4  ;;  %p2702_p1 = scmp.ge.s32.totalorder %s3444_s22, 1 }
   0x5   : > { %p273_p2 = scmp.lt.s32.totalorder %s3444_s22, 9 }
   0x6   : > { %s4095_s23 = smov (%p25_p0, %s24_s23), 0  ;;  %s4097_s24 = smov (!%p25_p0, %s27_s24), %s3440_s21 }
   0x7   : > { %p274_p3 = pnand %p2702_p1, %p273_p2  ;;  %p29_p4 = scmp.ge.s32.totalorder %s4097_s24, 2 }
   0x8   : > { %vm393_vm0 = vcmask (!%p274_p3), 31744   ;;  %vm396_vm1 = vcmask (!%p274_p3), 25600   ;;  %s3513_s25 = sshll.u32 (!%p274_p3), %s3428_s18, 2  ;;  %p338_p5 = scmp.lt.s32.totalorder (!%p274_p3), %s3432_s19, 1  ;;  %v3446_v0 = vmov (!%p274_p3), 0.0  }
   0x9   : > { %s4099_s24 = smov (%p29_p4, %s4097_s24), 0  ;;  %277 = sbr.rel (%p274_p3) target bundleno = 500 (0x1f4), region = 40 }
   0xa   : > { %4086 = sst [smem:[#allocation3_spill]] %s4099_s24  ;;  %398 = vst.msk [vmem:[#allocation2 + $0x18] sm:$0xff] (!%p274_p3), %vm393_vm0, %v3446_v0  ;;  %394 = vst.msk [vmem:[#allocation2] sm:$0xff] (!%p274_p3), %vm393_vm0, %v3446_v0  ;;  %p340_p6 = scmp.lt.s32.totalorder (!%p274_p3), %s3513_s25, 15 }
   0xb   : > { %395 = vst.msk [vmem:[#allocation2 + $0x8] sm:$0xff] (!%p274_p3), %vm393_vm0, %v3446_v0  ;;  %399 = vst.msk [vmem:[#allocation2 + $0x20] sm:$0xff] (!%p274_p3), %vm393_vm0, %v3446_v0  ;;  %s2708_s26 = sadd.s32 (!%p274_p3), 4294967295, %s3513_s25  ;;  %s2899_s6 = sadd.s32 (!%p274_p3), 4, %s3513_s25 }
   0xc   : > { %401 = vst.msk [vmem:[#allocation2 + $0x30] sm:$0xff] (!%p274_p3), %vm393_vm0, %v3446_v0  ;;  %402 = vst.msk [vmem:[#allocation2 + $0x38] sm:$0xff] (!%p274_p3), %vm393_vm0, %v3446_v0  ;;  %p350_p7 = scmp.gt.s32.totalorder (!%p274_p3), %s2708_s26, 0  ;;  %p2709_p8 = scmp.lt.s32.totalorder (!%p274_p3), %s2708_s26, 15 }
   0xd   : > { %404 = vst.msk [vmem:[#allocation2 + $0x48] sm:$0xff] (!%p274_p3), %vm393_vm0, %v3446_v0  ;;  %405 = vst.msk [vmem:[#allocation2 + $0x50] sm:$0xff] (!%p274_p3), %vm393_vm0, %v3446_v0  ;;  %p3547_p9 = scmp.lt.s32.totalorder (!%p274_p3), %s2899_s6, 15  ;;  %s4088_s0 = sld [smem:[#allocation4_spill]] (!%p274_p3) }
   0xe   : > { %407 = vst.msk [vmem:[#allocation2 + $0x60] sm:$0xff] (!%p274_p3), %vm393_vm0, %v3446_v0  ;;  %408 = vst.msk [vmem:[#allocation2 + $0x68] sm:$0xff] (!%p274_p3), %vm393_vm0, %v3446_v0  ;;  %s2724_s12 = sshll.u32 (!%p274_p3), %s3428_s18, 3  ;;  %p2728_p11 = scmp.le.s32.totalorder (!%p274_p3), %s3428_s18, 0 }
   0xf   : > { %410 = vst.msk [vmem:[#allocation2 + $0x78] sm:$0xff] (!%p274_p3), %vm393_vm0, %v3446_v0  ;;  %411 = vst.msk [vmem:[#allocation2 + $0x80] sm:$0xff] (!%p274_p3), %vm393_vm0, %v3446_v0  ;;  %p385_p10 = scmp.lt.s32.totalorder (!%p274_p3), %s2724_s12, 31 }
  0x10   : > { %400 = vst.msk [vmem:[#allocation2 + $0x28] sm:$0x3] %vm396_vm1, %v3446_v0  ;;  %397 = vst.msk [vmem:[#allocation2 + $0x10] sm:$0x3] %vm396_vm1, %v3446_v0  ;;  %s4101_s19 = smov (!%p338_p5, %s3432_s19), 1  ;;  %s4103_s6 = smov (!%p3547_p9, %s2899_s6), 15 }
  0x11   : > { %403 = vst.msk [vmem:[#allocation2 + $0x40] sm:$0x3] %vm396_vm1, %v3446_v0  ;;  %406 = vst.msk [vmem:[#allocation2 + $0x58] sm:$0x3] %vm396_vm1, %v3446_v0  ;;  %s341_s27 = scalar_select %p340_p6, %s3513_s25, 15 }
  0x12   : > { %409 = vst.msk [vmem:[#allocation2 + $0x70] sm:$0x3] %vm396_vm1, %v3446_v0  ;;  %412 = vst.msk [vmem:[#allocation2 + $0x88] sm:$0x3] %vm396_vm1, %v3446_v0  ;;  %s3543_s28 = sshll.u32 %s4101_s19, 5  ;;  %s4107_s6 = smov (!%p3547_p9, %s4103_s6), 15 }
  0x13   : > { %s2704_s29 = sshll.u32 %s341_s27, 1  ;;  %s2721_s16 = sshll.u32 %s4107_s6, 1 }
  0x14   : > { %s344_s30 = sadd.s32 %s3543_s28, %s2704_s29  ;;  %s375_s25 = sadd.s32 %s2721_s16, %s3543_s28 }
  0x15   : > { %s2706_s7 = sshll.u32 %s344_s30, 3  ;;  %s2723_s30 = sshll.u32 %s375_s25, 3 }
  0x16   : > { %s346_s11 = scalar_lea.vmem %s4088_s0, %s2706_s7  ;;  %s377_s8 = scalar_lea.vmem %s4081_s2, %s2723_s30 }
  0x17   : > { %s351_s13 = scalar_select %p350_p7, %s2708_s26, 0  ;;  %v413_v1 = vld [vmem:[%s346_s11] sm:$0xff]  ;;  %v414_v2 = vld [vmem:[%s346_s11 + $0x8] sm:$0xff]  ;;  %v415_v3 = vld [vmem:[%s346_s11 + $0x10] sm:$0xff] }
  0x18   : > { %422 = vst.msk [vmem:[#allocation2 + $0x19] sm:$0xff] %vm393_vm0, %v413_v1  ;;  %423 = vst.msk [vmem:[#allocation2 + $0x21] sm:$0xff] %vm393_vm0, %v414_v2  ;;  %v416_v4 = vld [vmem:[%s346_s11 + $0x18] sm:$0xff]  ;;  %v417_v5 = vld [vmem:[%s346_s11 + $0x20] sm:$0xff]  ;;  %s2726_s10 = sshll.u32 %s4101_s19, 6  ;;  %s4109_s12 = smov (!%p385_p10, %s2724_s12), 31 }
  0x19   : > { %424 = vst.msk [vmem:[#allocation2 + $0x31] sm:$0xff] %vm393_vm0, %v415_v3  ;;  %v418_v6 = vld [vmem:[%s346_s11 + $0x28] sm:$0xff]  ;;  %s4105_s13 = smov (!%p2709_p8, %s351_s13), 15  ;;  %425 = vst.msk [vmem:[#allocation2 + $0x39] sm:$0xff] %vm393_vm0, %v416_v4  ;;  %v419_v7 = vld [vmem:[%s346_s11 + $0x30] sm:$0xff]  ;;  %433 = sbr.rel (%p2728_p11) target bundleno = 32 (0x20), region = 44 }
  0x1a   : > { %426 = vst.msk [vmem:[#allocation2 + $0x49] sm:$0xff] %vm393_vm0, %v417_v5  ;;  %427 = vst.msk [vmem:[#allocation2 + $0x51] sm:$0xff] %vm393_vm0, %v418_v6  ;;  %v420_v8 = vld [vmem:[%s346_s11 + $0x38] sm:$0xff]  ;;  %s2714_s14 = sshll.u32 %s4105_s13, 1  ;;  %s2725_s11 = sshll.u32 %s4109_s12, 1 }
  0x1b   : > { %428 = vst.msk [vmem:[#allocation2 + $0x61] sm:$0xff] %vm393_vm0, %v419_v7  ;;  %429 = vst.msk [vmem:[#allocation2 + $0x69] sm:$0xff] %vm393_vm0, %v420_v8  ;;  %s358_s15 = sadd.s32 %s2714_s14, %s3543_s28  ;;  %s389_s13 = sadd.s32 %s2726_s10, %s2725_s11 }
  0x1c   : > { %s2716_s17 = sshll.u32 %s358_s15, 3  ;;  %s2727_s0 = sshll.u32 %s389_s13, 3 }
  0x1d   : > { %s360_s29 = scalar_lea.vmem %s4080_s1, %s2716_s17  ;;  %s3584_s6 = scalar_lea.vmem %s4084_s5, %s2727_s0 }
  0x1e   : > { %v434_v9 = vld [vmem:[%s360_s29] sm:$0xff] (!%p2728_p11)  ;;  %v435_v10 = vld [vmem:[%s360_s29 + $0x8] sm:$0xff] (!%p2728_p11) }
  0x1f   : > { %436 = vst.msk [vmem:[#allocation2 + $0x1] sm:$0xff] (!%p2728_p11), %vm393_vm0, %v434_v9  ;;  %437 = vst.msk [vmem:[#allocation2 + $0x9] sm:$0xff] (!%p2728_p11), %vm393_vm0, %v435_v10 }
  0x20 PF: > { %p2729_p12 = scmp.ge.s32.totalorder %s3428_s18, 3 }
  0x21   : > { %v442_v11 = vld [vmem:[%s377_s8] sm:$0xff] (!%p2729_p12)  ;;  %v443_v12 = vld [vmem:[%s377_s8 + $0x8] sm:$0xff] (!%p2729_p12) }
  0x22   : > { %441 = sbr.rel (%p2729_p12) target bundleno = 41 (0x29), region = 48  ;;  %445 = vst.msk [vmem:[#allocation2 + $0x79] sm:$0xff] (!%p2729_p12), %vm393_vm0, %v442_v11  ;;  %446 = vst.msk [vmem:[#allocation2 + $0x81] sm:$0xff] (!%p2729_p12), %vm393_vm0, %v443_v12 }
  0x29 PF: > { %vm511_vm2 = vcmask 1043456   ;;  %v2771_v13 = vld [vmem:[%s4082_s3 + $0x14] sm:$0xf]  ;;  %v471_v14 = vld [vmem:[#allocation2 + $0x2] sm:$0xff]  ;;  %v472_v15 = vld [vmem:[#allocation2 + $0xa] sm:$0xff]  ;;  %s3447_s30 = smov 4  }
  0x2a   : > { %3100 = vmatprep.subr.msk.mxu1 %vm511_vm2, %v2771_v13  ;;  %3102 = vmatprep.mubr.msk.f32.mxu1 %vm393_vm0, %v471_v14  ;;  %v2770_v16 = vld [vmem:[%s4082_s3 + $0x10] sm:$0xf]  ;;  %v3600_v17 = vld [vmem:[#allocation2 + $0x1a] sm:$0xff]  ;;  %v3608_v18 = vld [vmem:[#allocation2 + $0x22] sm:$0xff]  ;;  %vm2534_vm3 = vcmask 64512  }
  0x2b   : > { %3101 = vmatpush3.msk.msra.mxu1 %vm511_vm2, %v2771_v13  ;;  %v459_v19 = vld [vmem:[#allocation2 + $0x1] sm:$0xff]  ;;  %v2790_v20 = vld [vmem:[%s4082_s3 + $0x18] sm:$0xf]  ;;  %v3626_v24 = vld [vmem:[#allocation2 + $0x4a] sm:$0xff] }
  0x2c   : > { %3103 = vmatmul.mubr.msk.f32.vlgmr.msra.gmra.mrb[0].mxu1 %vm393_vm0, %v472_v15  ;;  %3114 = vmatprep.subr.msk.mxu1 %vm511_vm2, %v2770_v16  ;;  %v3613_v21 = vld [vmem:[#allocation2 + $0x32] sm:$0xff]  ;;  %v3621_v22 = vld [vmem:[#allocation2 + $0x3a] sm:$0xff]  ;;  %v2730_v23 = vld [vmem:[%s4082_s3 + $0x4] sm:$0xf] }
  0x2d   : > { %3115 = vmatpush3.msk.msra.mxu1 %vm511_vm2, %v2770_v16  ;;  %3105 = vmatprep.mubr.msk.f32.mxu1 %vm393_vm0, %v3600_v17  ;;  %v460_v25 = vld [vmem:[#allocation2 + $0x9] sm:$0xff]  ;;  %v484_v26 = vld [vmem:[%s4082_s3] sm:$0xf]  ;;  %v3640_v28 = vld [vmem:[#allocation2 + $0x52] sm:$0xff] }
  0x2e   : > { %3128 = vmatprep.subr.msk.mxu1 %vm511_vm2, %v2790_v20  ;;  %3046 = vmatprep.mubr.msk.f32.mxu0 %vm393_vm0, %v459_v19  ;;  %v3635_v27 = vld [vmem:[#allocation2 + $0x19] sm:$0xff]  ;;  %v3645_v29 = vld [vmem:[#allocation2 + $0x21] sm:$0xff]  ;;  %v3653_v31 = vld [vmem:[#allocation2 + $0x31] sm:$0xff] }
  0x2f   : > { %3044 = vmatprep.subr.msk.mxu0 %vm511_vm2, %v2730_v23  ;;  %v2749_v30 = vld [vmem:[%s4082_s3 + $0x8] sm:$0xf]  ;;  %v3661_v32 = vld [vmem:[#allocation2 + $0x39] sm:$0xff]  ;;  %v3677_v36 = vld [vmem:[#allocation2 + $0x51] sm:$0xff] }
  0x30   : > { %3106 = vmatmul.mubr.msk.f32.gmra.mrb[2].mxu1 %vm393_vm0, %v3608_v18  ;;  %3045 = vmatpush3.msk.msra.mxu0 %vm511_vm2, %v2730_v23  ;;  %v2800_v33 = vld [vmem:[%s4082_s3 + $0x1c] sm:$0xf]  ;;  %v3672_v34 = vld [vmem:[#allocation2 + $0x49] sm:$0xff]  ;;  %v447_v35 = vld [vmem:[#allocation2] sm:$0xff] }
  0x31   : > { %3108 = vmatprep.mubr.msk.f32.mxu1 %vm393_vm0, %v3613_v21  ;;  %3047 = vmatmul.mubr.msk.f32.vlgmr.msra.gmra.mrb[0].mxu0 %vm393_vm0, %v460_v25  ;;  %v448_v37 = vld [vmem:[#allocation2 + $0x8] sm:$0xff]  ;;  %v3686_v38 = vld [vmem:[#allocation2 + $0x18] sm:$0xff]  ;;  %v3698_v40 = vld [vmem:[#allocation2 + $0x20] sm:$0xff] }
  0x32   : > { %3049 = vmatprep.mubr.msk.f32.mxu0 %vm393_vm0, %v3635_v27  ;;  %3058 = vmatprep.subr.msk.mxu0 %vm511_vm2, %v484_v26  ;;  %v2759_v39 = vld [vmem:[%s4082_s3 + $0xc] sm:$0xf]  ;;  %v3700_v41 = vld [vmem:[#allocation2 + $0x30] sm:$0xff]  ;;  %v3712_v42 = vld [vmem:[#allocation2 + $0x38] sm:$0xff] }
  0x33   : > { %3059 = vmatpush3.msk.msra.mxu0 %vm511_vm2, %v484_v26  ;;  %v2851_v43 = vld [vmem:[%s4082_s3 + $0x34] sm:$0xf]  ;;  %v3717_v44 = vld [vmem:[#allocation2 + $0x48] sm:$0xff]  ;;  %v2811_v47 = vld [vmem:[%s4082_s3 + $0x24] sm:$0xf] }
  0x34   : > { %3109 = vmatmul.mubr.msk.f32.gmra.mrb[4].mxu1 %vm393_vm0, %v3621_v22  ;;  %3072 = vmatprep.subr.msk.mxu0 %vm511_vm2, %v2749_v30  ;;  %v3726_v45 = vld [vmem:[#allocation2 + $0x50] sm:$0xff]  ;;  %v3739_v46 = vld [vmem:[#allocation2 + $0x61] sm:$0xff]  ;;  %v2870_v55 = vld [vmem:[%s4082_s3 + $0x38] sm:$0xf] }
  0x35   : > { %3111 = vmatprep.mubr.msk.f32.mxu1 %vm393_vm0, %v3626_v24  ;;  %3050 = vmatmul.mubr.msk.f32.gmra.mrb[2].mxu0 %vm393_vm0, %v3645_v29  ;;  %v3750_v48 = vld [vmem:[#allocation2 + $0x69] sm:$0xff]  ;;  %v3767_v50 = vld [vmem:[#allocation2 + $0x60] sm:$0xff]  ;;  %v2880_v57 = vld [vmem:[%s4082_s3 + $0x3c] sm:$0xf] }
  0x36   : > { %3052 = vmatprep.mubr.msk.f32.mxu0 %vm393_vm0, %v3653_v31  ;;  %v2850_v49 = vld [vmem:[%s4082_s3 + $0x30] sm:$0xf]  ;;  %v3776_v51 = vld [vmem:[#allocation2 + $0x68] sm:$0xff]  ;;  %v2810_v53 = vld [vmem:[%s4082_s3 + $0x20] sm:$0xf] }
  0x37   : > { %v3789_v52 = vld [vmem:[#allocation2 + $0x62] sm:$0xff]  ;;  %v3800_v54 = vld [vmem:[#allocation2 + $0x6a] sm:$0xff]  ;;  %v469_v59 = vld [vmem:[#allocation2 + $0x79] sm:$0xff] }
  0x38   : > { %3112 = vmatmul.mubr.msk.f32.gmra.mrb[6].mxu1 %vm393_vm0, %v3640_v28  ;;  %v2830_v56 = vld [vmem:[%s4082_s3 + $0x28] sm:$0xf]  ;;  %v2840_v58 = vld [vmem:[%s4082_s3 + $0x2c] sm:$0xf]  ;;  %v457_v61 = vld [vmem:[#allocation2 + $0x78] sm:$0xff] }
  0x39   : > { %3116 = vmatprep.mubr.msk.f32.mxu1 %vm393_vm0, %v459_v19  ;;  %3053 = vmatmul.mubr.msk.f32.gmra.mrb[4].mxu0 %vm393_vm0, %v3661_v32  ;;  %v470_v60 = vld [vmem:[#allocation2 + $0x81] sm:$0xff]  ;;  %v3963_v1 = vld [vmem:[%s4083_s4] ss:$0 sm:$0xff] }
  0x3a   : > { %3055 = vmatprep.mubr.msk.f32.mxu0 %vm393_vm0, %v3672_v34  ;;  %v458_v62 = vld [vmem:[#allocation2 + $0x80] sm:$0xff] }
  0x3b   : > { %v481_v63 = vld [vmem:[#allocation2 + $0x7a] sm:$0xff]  ;;  %v482_v0 = vld [vmem:[#allocation2 + $0x82] sm:$0xff] }
  0x3c   : > { %3117 = vmatmul.mubr.msk.f32.vlgmr.msra.gmra.mrb[0].mxu1 %vm393_vm0, %v460_v25 }
  0x3d   : > { %3129 = vmatpush3.msk.msra.mxu1 %vm511_vm2, %v2790_v20  ;;  %3119 = vmatprep.mubr.msk.f32.mxu1 %vm393_vm0, %v3635_v27 }
  0x3e   : > { %3142 = vmatprep.subr.msk.mxu1 %vm511_vm2, %v2800_v33  ;;  %3056 = vmatmul.mubr.msk.f32.gmra.mrb[6].mxu0 %vm393_vm0, %v3677_v36 }
  0x3f   : > { %3060 = vmatprep.mubr.msk.f32.mxu0 %vm393_vm0, %v447_v35 }
  0x40   : > { %3120 = vmatmul.mubr.msk.f32.gmra.mrb[2].mxu1 %vm393_vm0, %v3645_v29 }
  0x41   : > { %3122 = vmatprep.mubr.msk.f32.mxu1 %vm393_vm0, %v3653_v31 }
  0x42   : > { %3061 = vmatmul.mubr.msk.f32.vlgmr.msra.gmra.mrb[0].mxu0 %vm393_vm0, %v448_v37 }
  0x43   : > { %3063 = vmatprep.mubr.msk.f32.mxu0 %vm393_vm0, %v3686_v38  ;;  %3073 = vmatpush3.msk.msra.mxu0 %vm511_vm2, %v2749_v30 }
  0x44   : > { %3123 = vmatmul.mubr.msk.f32.gmra.mrb[4].mxu1 %vm393_vm0, %v3661_v32  ;;  %3086 = vmatprep.subr.msk.mxu0 %vm511_vm2, %v2759_v39 }
  0x45   : > { %3125 = vmatprep.mubr.msk.f32.mxu1 %vm393_vm0, %v3672_v34 }
  0x46   : > { %3064 = vmatmul.mubr.msk.f32.gmra.mrb[2].mxu0 %vm393_vm0, %v3698_v40 }
  0x47   : > { %3066 = vmatprep.mubr.msk.f32.mxu0 %vm393_vm0, %v3700_v41 }
  0x48   : > { %3126 = vmatmul.mubr.msk.f32.gmra.mrb[6].mxu1 %vm393_vm0, %v3677_v36 }
  0x49   : > { %3130 = vmatprep.mubr.msk.f32.mxu1 %vm393_vm0, %v3635_v27 }
  0x4a   : > { %3067 = vmatmul.mubr.msk.f32.gmra.mrb[4].mxu0 %vm393_vm0, %v3712_v42 }
  0x4b   : > { %3069 = vmatprep.mubr.msk.f32.mxu0 %vm393_vm0, %v3717_v44 }
  0x4c   : > { %3131 = vmatmul.mubr.msk.f32.vlgmr.msra.gmra.mrb[0].mxu1 %vm393_vm0, %v3645_v29 }
  0x4d   : > { %3143 = vmatpush3.msk.msra.mxu1 %vm511_vm2, %v2800_v33  ;;  %3133 = vmatprep.mubr.msk.f32.mxu1 %vm393_vm0, %v3653_v31 }
  0x4e   : > { %3212 = vmatprep.subr.msk.mxu1 %vm511_vm2, %v2851_v43  ;;  %3070 = vmatmul.mubr.msk.f32.gmra.mrb[6].mxu0 %vm393_vm0, %v3726_v45 }
  0x4f   : > { %3074 = vmatprep.mubr.msk.f32.mxu0 %vm393_vm0, %v3686_v38 }
  0x50   : > { %3134 = vmatmul.mubr.msk.f32.gmra.mrb[2].mxu1 %vm393_vm0, %v3661_v32 }
  0x51   : > { %3136 = vmatprep.mubr.msk.f32.mxu1 %vm393_vm0, %v3672_v34 }
  0x52   : > { %3075 = vmatmul.mubr.msk.f32.vlgmr.msra.gmra.mrb[0].mxu0 %vm393_vm0, %v3698_v40 }
  0x53   : > { %3077 = vmatprep.mubr.msk.f32.mxu0 %vm393_vm0, %v3700_v41  ;;  %3087 = vmatpush3.msk.msra.mxu0 %vm511_vm2, %v2759_v39 }
  0x54   : > { %3137 = vmatmul.mubr.msk.f32.gmra.mrb[4].mxu1 %vm393_vm0, %v3677_v36  ;;  %3156 = vmatprep.subr.msk.mxu0 %vm511_vm2, %v2811_v47 }
  0x55   : > { %3139 = vmatprep.mubr.msk.f32.mxu1 %vm393_vm0, %v3739_v46 }
  0x56   : > { %3078 = vmatmul.mubr.msk.f32.gmra.mrb[2].mxu0 %vm393_vm0, %v3712_v42 }
  0x57   : > { %3080 = vmatprep.mubr.msk.f32.mxu0 %vm393_vm0, %v3717_v44 }
  0x58   : > { %3140 = vmatmul.mubr.msk.f32.gmra.mrb[6].mxu1 %vm393_vm0, %v3750_v48 }
  0x59   : > { %3144 = vmatprep.mubr.msk.f32.mxu1 %vm393_vm0, %v3600_v17 }
  0x5a   : > { %3081 = vmatmul.mubr.msk.f32.gmra.mrb[4].mxu0 %vm393_vm0, %v3726_v45 }
  0x5b   : > { %3083 = vmatprep.mubr.msk.f32.mxu0 %vm393_vm0, %v3767_v50 }
  0x5c   : > { %3145 = vmatmul.mubr.msk.f32.vlgmr.msra.gmra.mrb[0].mxu1 %vm393_vm0, %v3608_v18 }
  0x5d   : > { %3213 = vmatpush3.msk.msra.mxu1 %vm511_vm2, %v2851_v43  ;;  %3147 = vmatprep.mubr.msk.f32.mxu1 %vm393_vm0, %v3613_v21 }
  0x5e   : > { %3226 = vmatprep.subr.msk.mxu1 %vm511_vm2, %v2850_v49  ;;  %3084 = vmatmul.mubr.msk.f32.gmra.mrb[6].mxu0 %vm393_vm0, %v3776_v51 }
  0x5f   : > { %3088 = vmatprep.mubr.msk.f32.mxu0 %vm393_vm0, %v3635_v27 }
  0x60   : > { %3148 = vmatmul.mubr.msk.f32.gmra.mrb[2].mxu1 %vm393_vm0, %v3621_v22 }
  0x61   : > { %3150 = vmatprep.mubr.msk.f32.mxu1 %vm393_vm0, %v3626_v24 }
  0x62   : > { %3089 = vmatmul.mubr.msk.f32.vlgmr.msra.gmra.mrb[0].mxu0 %vm393_vm0, %v3645_v29 }
  0x63   : > { %3091 = vmatprep.mubr.msk.f32.mxu0 %vm393_vm0, %v3653_v31  ;;  %3157 = vmatpush3.msk.msra.mxu0 %vm511_vm2, %v2811_v47 }
  0x64   : > { %3151 = vmatmul.mubr.msk.f32.gmra.mrb[4].mxu1 %vm393_vm0, %v3640_v28  ;;  %3170 = vmatprep.subr.msk.mxu0 %vm511_vm2, %v2810_v53 }
  0x65   : > { %3153 = vmatprep.mubr.msk.f32.mxu1 %vm393_vm0, %v3789_v52 }
  0x66   : > { %3092 = vmatmul.mubr.msk.f32.gmra.mrb[2].mxu0 %vm393_vm0, %v3661_v32 }
  0x67   : > { %3094 = vmatprep.mubr.msk.f32.mxu0 %vm393_vm0, %v3672_v34 }
  0x68   : > { %3154 = vmatmul.mubr.msk.f32.gmra.mrb[6].mxu1 %vm393_vm0, %v3800_v54 }
  0x69   : > { %3214 = vmatprep.mubr.msk.f32.mxu1 %vm393_vm0, %v3600_v17 }
  0x6a   : > { %3095 = vmatmul.mubr.msk.f32.gmra.mrb[4].mxu0 %vm393_vm0, %v3677_v36 }
  0x6b   : > { %3097 = vmatprep.mubr.msk.f32.mxu0 %vm393_vm0, %v3739_v46 }
  0x6c   : > { %3215 = vmatmul.mubr.msk.f32.vlgmr.msra.gmra.mrb[8].mxu1 %vm393_vm0, %v3608_v18 }
  0x6d   : > { %3227 = vmatpush3.msk.msra.mxu1 %vm511_vm2, %v2850_v49  ;;  %3217 = vmatprep.mubr.msk.f32.mxu1 %vm393_vm0, %v3613_v21 }
  0x6e   : > { %3240 = vmatprep.subr.msk.mxu1 %vm511_vm2, %v2870_v55  ;;  %3098 = vmatmul.mubr.msk.f32.gmra.mrb[6].mxu0 %vm393_vm0, %v3750_v48 }
  0x6f   : > { %3158 = vmatprep.mubr.msk.f32.mxu0 %vm393_vm0, %v3635_v27 }
  0x70   : > { %3218 = vmatmul.mubr.msk.f32.gmra.mrb[10].mxu1 %vm393_vm0, %v3621_v22 }
  0x71   : > { %3220 = vmatprep.mubr.msk.f32.mxu1 %vm393_vm0, %v3626_v24 }
  0x72   : > { %3159 = vmatmul.mubr.msk.f32.vlgmr.msra.gmra.mrb[8].mxu0 %vm393_vm0, %v3645_v29 }
  0x73   : > { %3161 = vmatprep.mubr.msk.f32.mxu0 %vm393_vm0, %v3653_v31  ;;  %3171 = vmatpush3.msk.msra.mxu0 %vm511_vm2, %v2810_v53 }
  0x74   : > { %3221 = vmatmul.mubr.msk.f32.gmra.mrb[12].mxu1 %vm393_vm0, %v3640_v28  ;;  %3184 = vmatprep.subr.msk.mxu0 %vm511_vm2, %v2830_v56 }
  0x75   : > { %3223 = vmatprep.mubr.msk.f32.mxu1 %vm393_vm0, %v3789_v52 }
  0x76   : > { %3162 = vmatmul.mubr.msk.f32.gmra.mrb[10].mxu0 %vm393_vm0, %v3661_v32 }
  0x77   : > { %3164 = vmatprep.mubr.msk.f32.mxu0 %vm393_vm0, %v3672_v34 }
  0x78   : > { %3224 = vmatmul.mubr.msk.f32.gmra.mrb[14].mxu1 %vm393_vm0, %v3800_v54 }
  0x79   : > { %3228 = vmatprep.mubr.msk.f32.mxu1 %vm393_vm0, %v3635_v27 }
  0x7a   : > { %3165 = vmatmul.mubr.msk.f32.gmra.mrb[12].mxu0 %vm393_vm0, %v3677_v36 }
  0x7b   : > { %3167 = vmatprep.mubr.msk.f32.mxu0 %vm393_vm0, %v3739_v46 }
  0x7c   : > { %3229 = vmatmul.mubr.msk.f32.vlgmr.msra.gmra.mrb[8].mxu1 %vm393_vm0, %v3645_v29 }
  0x7d   : > { %3241 = vmatpush3.msk.msra.mxu1 %vm511_vm2, %v2870_v55  ;;  %3231 = vmatprep.mubr.msk.f32.mxu1 %vm393_vm0, %v3653_v31 }
  0x7e   : > { %3254 = vmatprep.subr.msk.mxu1 %vm511_vm2, %v2880_v57  ;;  %3168 = vmatmul.mubr.msk.f32.gmra.mrb[14].mxu0 %vm393_vm0, %v3750_v48 }
  0x7f   : > { %3172 = vmatprep.mubr.msk.f32.mxu0 %vm393_vm0, %v3686_v38 }
  0x80   : > { %3232 = vmatmul.mubr.msk.f32.gmra.mrb[10].mxu1 %vm393_vm0, %v3661_v32 }
  0x81   : > { %3234 = vmatprep.mubr.msk.f32.mxu1 %vm393_vm0, %v3672_v34 }
  0x82   : > { %3173 = vmatmul.mubr.msk.f32.vlgmr.msra.gmra.mrb[8].mxu0 %vm393_vm0, %v3698_v40 }
  0x83   : > { %3175 = vmatprep.mubr.msk.f32.mxu0 %vm393_vm0, %v3700_v41  ;;  %3185 = vmatpush3.msk.msra.mxu0 %vm511_vm2, %v2830_v56 }
  0x84   : > { %3235 = vmatmul.mubr.msk.f32.gmra.mrb[12].mxu1 %vm393_vm0, %v3677_v36  ;;  %3198 = vmatprep.subr.msk.mxu0 %vm511_vm2, %v2840_v58 }
  0x85   : > { %3237 = vmatprep.mubr.msk.f32.mxu1 %vm393_vm0, %v3739_v46 }
  0x86   : > { %3176 = vmatmul.mubr.msk.f32.gmra.mrb[10].mxu0 %vm393_vm0, %v3712_v42 }
  0x87   : > { %3178 = vmatprep.mubr.msk.f32.mxu0 %vm393_vm0, %v3717_v44 }
  0x88   : > { %3238 = vmatmul.mubr.msk.f32.gmra.mrb[14].mxu1 %vm393_vm0, %v3750_v48 }
  0x89   : > { %3242 = vmatprep.mubr.msk.f32.mxu1 %vm393_vm0, %v3653_v31 }
  0x8a   : > { %3179 = vmatmul.mubr.msk.f32.gmra.mrb[12].mxu0 %vm393_vm0, %v3726_v45 }
  0x8b   : > { %3181 = vmatprep.mubr.msk.f32.mxu0 %vm393_vm0, %v3767_v50 }
  0x8c   : > { %3243 = vmatmul.mubr.msk.f32.vlgmr.msra.gmra.mrb[8].mxu1 %vm393_vm0, %v3661_v32 }
  0x8d   : > { %3255 = vmatpush3.msk.msra.mxu1 %vm511_vm2, %v2880_v57  ;;  %3245 = vmatprep.mubr.msk.f32.mxu1 %vm393_vm0, %v3672_v34 }
  0x8e   : > { %3182 = vmatmul.mubr.msk.f32.gmra.mrb[14].mxu0 %vm393_vm0, %v3776_v51 }
  0x8f   : > { %3186 = vmatprep.mubr.msk.f32.mxu0 %vm393_vm0, %v3700_v41 }
  0x90   : > { %3246 = vmatmul.mubr.msk.f32.gmra.mrb[10].mxu1 %vm393_vm0, %v3677_v36 }
  0x91   : > { %3248 = vmatprep.mubr.msk.f32.mxu1 %vm393_vm0, %v3739_v46 }
  0x92   : > { %3187 = vmatmul.mubr.msk.f32.vlgmr.msra.gmra.mrb[8].mxu0 %vm393_vm0, %v3712_v42 }
  0x93   : > { %3189 = vmatprep.mubr.msk.f32.mxu0 %vm393_vm0, %v3717_v44  ;;  %3199 = vmatpush3.msk.msra.mxu0 %vm511_vm2, %v2840_v58 }
  0x94   : > { %3249 = vmatmul.mubr.msk.f32.gmra.mrb[12].mxu1 %vm393_vm0, %v3750_v48 }
  0x95   : > { %3251 = vmatprep.mubr.msk.f32.mxu1 %vm393_vm0, %v469_v59 }
  0x96   : > { %3190 = vmatmul.mubr.msk.f32.gmra.mrb[10].mxu0 %vm393_vm0, %v3726_v45 }
  0x97   : > { %3192 = vmatprep.mubr.msk.f32.mxu0 %vm393_vm0, %v3767_v50 }
  0x98   : > { %3252 = vmatmul.mubr.msk.f32.gmra.mrb[14].mxu1 %vm393_vm0, %v470_v60 }
  0x99   : > { %3256 = vmatprep.mubr.msk.f32.mxu1 %vm393_vm0, %v3613_v21 }
  0x9a   : > { %3193 = vmatmul.mubr.msk.f32.gmra.mrb[12].mxu0 %vm393_vm0, %v3776_v51 }
  0x9b   : > { %3195 = vmatprep.mubr.msk.f32.mxu0 %vm393_vm0, %v457_v61 }
  0x9c   : > { %3257 = vmatmul.mubr.msk.f32.vlgmr.msra.gmra.mrb[8].mxu1 %vm393_vm0, %v3621_v22 }
  0x9d   : > { %3259 = vmatprep.mubr.msk.f32.mxu1 %vm393_vm0, %v3626_v24 }
  0x9e   : > { %3196 = vmatmul.mubr.msk.f32.gmra.mrb[14].mxu0 %vm393_vm0, %v458_v62 }
  0x9f   : > { %3200 = vmatprep.mubr.msk.f32.mxu0 %vm393_vm0, %v3653_v31 }
  0xa0   : > { %3260 = vmatmul.mubr.msk.f32.gmra.mrb[10].mxu1 %vm393_vm0, %v3640_v28 }
  0xa1   : > { %3262 = vmatprep.mubr.msk.f32.mxu1 %vm393_vm0, %v3789_v52 }
  0xa2   : > { %3201 = vmatmul.mubr.msk.f32.vlgmr.msra.gmra.mrb[8].mxu0 %vm393_vm0, %v3661_v32 }
  0xa3   : > { %3203 = vmatprep.mubr.msk.f32.mxu0 %vm393_vm0, %v3672_v34 }
  0xa4   : > { %3263 = vmatmul.mubr.msk.f32.gmra.mrb[12].mxu1 %vm393_vm0, %v3800_v54 }
  0xa5   : > { %3265 = vmatprep.mubr.msk.f32.mxu1 %vm393_vm0, %v481_v63 }
  0xa6   : > { %3204 = vmatmul.mubr.msk.f32.gmra.mrb[10].mxu0 %vm393_vm0, %v3677_v36 }
  0xa7   : > { %3206 = vmatprep.mubr.msk.f32.mxu0 %vm393_vm0, %v3739_v46 }
  0xa8   : > { %3266 = vmatmul.mubr.msk.f32.gmra.mrb[14].mxu1 %vm393_vm0, %v482_v0 }
  0xaa   : > { %3207 = vmatmul.mubr.msk.f32.gmra.mrb[12].mxu0 %vm393_vm0, %v3750_v48 }
  0xab   : > { %3209 = vmatprep.mubr.msk.f32.mxu0 %vm393_vm0, %v469_v59 }
  0xae   : > { %3210 = vmatmul.mubr.msk.f32.gmra.mrb[14].mxu0 %vm393_vm0, %v470_v60 }
 0x12f   : > { %v3146_v2 = vpop.f32.mrb[0].mxu1 }
 0x130   : > { %v1501_v3 = vadd.f32 %v3146_v2, %v3963_v1  ;;  %v1453_v4 = vpop.f32.mrb[1].mxu1 }
 0x131   : > { %v1500_v6 = vadd.f32 %v3963_v1, %v1453_v4 }
 0x132   : > { %1518 = vrot.lane.b32.xlu0 %v1501_v3, %s3447_s30 }
 0x133   : > { %v3149_v5 = vpop.f32.mrb[2].mxu1 }
 0x134   : > { %v1503_v7 = vadd.f32 %v3149_v5, %v3963_v1  ;;  %v1463_v8 = vpop.f32.mrb[3].mxu1 }
 0x135   : > { %v3090_v10 = vpop.f32.mrb[0].mxu0  ;;  %v1502_v11 = vadd.f32 %v3963_v1, %v1463_v8 }
 0x136   : > { %1516 = vrot.lane.b32.xlu0 %v1500_v6, %s3447_s30  ;;  %1522 = vrot.lane.b32.xlu1 %v1503_v7, %s3447_s30  ;;  %v953_v13 = vpop.f32.mrb[1].mxu0  ;;  %v1007_v50 = vadd.f32 %v3090_v10, %v3963_v1 }
 0x137   : > { %v3152_v9 = vpop.f32.mrb[4].mxu1  ;;  %v1006_v53 = vadd.f32 %v3963_v1, %v953_v13 }
 0x138   : > { %v1473_v12 = vpop.f32.mrb[5].mxu1  ;;  %v1505_v17 = vadd.f32 %v3152_v9, %v3963_v1 }
 0x139   : > { %v1504_v14 = vadd.f32 %v3963_v1, %v1473_v12  ;;  %v3093_v16 = vpop.f32.mrb[2].mxu0 }
 0x13a   : > { %1520 = vrot.lane.b32.xlu1 %v1502_v11, %s3447_s30  ;;  %v963_v19 = vpop.f32.mrb[3].mxu0  ;;  %v1009_v54 = vadd.f32 %v3093_v16, %v3963_v1 }
 0x13b   : > { %1524 = vrot.lane.b32.xlu0 %v1504_v14, %s3447_s30  ;;  %v3155_v15 = vpop.f32.mrb[6].mxu1  ;;  %v1008_v59 = vadd.f32 %v3963_v1, %v963_v19 }
 0x13c   : > { %v1483_v18 = vpop.f32.mrb[7].mxu1  ;;  %v1507_v22 = vadd.f32 %v3155_v15, %v3963_v1 }
 0x13d   : > { %v1506_v20 = vadd.f32 %v3963_v1, %v1483_v18  ;;  %v3096_v21 = vpop.f32.mrb[4].mxu0 }
 0x13e   : > { %1526 = vrot.lane.b32.xlu1 %v1505_v17, %s3447_s30  ;;  %v973_v23 = vpop.f32.mrb[5].mxu0  ;;  %v1011_v2 = vadd.f32 %v3096_v21, %v3963_v1 }
 0x13f   : > { %1528 = vrot.lane.b32.xlu0 %v1506_v20, %s3447_s30  ;;  %v1010_v60 = vadd.f32 %v3963_v1, %v973_v23 }
 0x141   : > { %v3981_v24 = vpop.f32.mrb[6].mxu0 }
 0x142   : > { %1530 = vrot.lane.b32.xlu1 %v1507_v22, %s3447_s30  ;;  %v983_v25 = vpop.f32.mrb[7].mxu0  ;;  %v1013_v8 = vadd.f32 %v3981_v24, %v3963_v1 }
 0x143   : > { %v1012_v3 = vadd.f32 %v3963_v1, %v983_v25 }
 0x16f   : > { %v3258_v26 = vpop.f32.mrb[8].mxu1 }
 0x170   : > { %v2487_v27 = vadd.f32 %v3258_v26, %v3963_v1  ;;  %v2439_v28 = vpop.f32.mrb[9].mxu1 }
 0x171   : > { %v2486_v29 = vadd.f32 %v3963_v1, %v2439_v28 }
 0x172   : > { %2504 = vrot.lane.b32.xlu1 %v2487_v27, %s3447_s30 }
 0x173   : > { %v3261_v30 = vpop.f32.mrb[10].mxu1  ;;  %2502 = vrot.lane.b32.xlu0 %v2486_v29, %s3447_s30 }
 0x174   : > { %v2489_v31 = vadd.f32 %v3261_v30, %v3963_v1  ;;  %v2449_v32 = vpop.f32.mrb[11].mxu1 }
 0x175   : > { %v2488_v33 = vadd.f32 %v3963_v1, %v2449_v32  ;;  %v3202_v35 = vpop.f32.mrb[8].mxu0 }
 0x176   : > { %2508 = vrot.lane.b32.xlu1 %v2489_v31, %s3447_s30  ;;  %v1969_v38 = vpop.f32.mrb[9].mxu0  ;;  %v2017_v11 = vadd.f32 %v3202_v35, %v3963_v1 }
 0x177   : > { %v3264_v34 = vpop.f32.mrb[12].mxu1  ;;  %2506 = vrot.lane.b32.xlu0 %v2488_v33, %s3447_s30  ;;  %v2016_v12 = vadd.f32 %v3963_v1, %v1969_v38 }
 0x178   : > { %v2491_v36 = vadd.f32 %v3264_v34, %v3963_v1  ;;  %v2459_v37 = vpop.f32.mrb[13].mxu1 }
 0x179   : > { %v2490_v39 = vadd.f32 %v3963_v1, %v2459_v37  ;;  %v3205_v41 = vpop.f32.mrb[10].mxu0 }
 0x17a   : > { %2512 = vrot.lane.b32.xlu1 %v2491_v36, %s3447_s30  ;;  %v1979_v44 = vpop.f32.mrb[11].mxu0  ;;  %v2019_v17 = vadd.f32 %v3205_v41, %v3963_v1 }
 0x17b   : > { %v3267_v40 = vpop.f32.mrb[14].mxu1  ;;  %2510 = vrot.lane.b32.xlu0 %v2490_v39, %s3447_s30  ;;  %v2018_v18 = vadd.f32 %v3963_v1, %v1979_v44 }
 0x17c   : > { %v2493_v42 = vadd.f32 %v3267_v40, %v3963_v1  ;;  %v2469_v43 = vpop.f32.mrb[15].mxu1 }
 0x17d   : > { %v2492_v45 = vadd.f32 %v3963_v1, %v2469_v43  ;;  %v3208_v46 = vpop.f32.mrb[12].mxu0 }
 0x17e   : > { %2516 = vrot.lane.b32.xlu1 %v2493_v42, %s3447_s30  ;;  %v1989_v47 = vpop.f32.mrb[13].mxu0  ;;  %v2021_v23 = vadd.f32 %v3208_v46, %v3963_v1 }
 0x17f   : > { %2514 = vrot.lane.b32.xlu0 %v2492_v45, %s3447_s30  ;;  %v2020_v24 = vadd.f32 %v3963_v1, %v1989_v47 }
 0x181   : > { %v3211_v48 = vpop.f32.mrb[14].mxu0 }
 0x182   : > { %v1999_v49 = vpop.f32.mrb[15].mxu0  ;;  %v2023_v29 = vadd.f32 %v3211_v48, %v3963_v1 }
 0x183   : > { %v2022_v30 = vadd.f32 %v3963_v1, %v1999_v49 }
 0x1a4   : > { %v1519_v51 = vpop.permute.xlu0 %1518 }
 0x1a5   : > { %v1541_v52 = vsel %vm393_vm0, %v1007_v50, %v1519_v51 }
 0x1a6   : > { %2536 = vst.msk [vmem:[%s3584_s6 + $0x8] sm:$0xff] %vm2534_vm3, %v1541_v52 }
 0x1a8   : > { %v1517_v55 = vpop.permute.xlu0 %1516  ;;  %v1523_v56 = vpop.permute.xlu1 %1522 }
 0x1a9   : > { %v1540_v57 = vsel %vm393_vm0, %v1006_v53, %v1517_v55  ;;  %v1543_v58 = vsel %vm393_vm0, %v1009_v54, %v1523_v56 }
 0x1aa   : > { %2535 = vst.msk [vmem:[%s3584_s6] sm:$0xff] %vm2534_vm3, %v1540_v57  ;;  %2540 = vst.msk [vmem:[%s3584_s6 + $0x28] sm:$0xff] %vm2534_vm3, %v1543_v58 }
 0x1ac   : > { %v1521_v61 = vpop.permute.xlu1 %1520 }
 0x1ad   : > { %v1542_v62 = vsel %vm393_vm0, %v1008_v59, %v1521_v61  ;;  %v1525_v63 = vpop.permute.xlu0 %1524 }
 0x1ae   : > { %2539 = vst.msk [vmem:[%s3584_s6 + $0x20] sm:$0xff] %vm2534_vm3, %v1542_v62  ;;  %v1544_v0 = vsel %vm393_vm0, %v1010_v60, %v1525_v63 }
 0x1af   : > { %2543 = vst.msk [vmem:[%s3584_s6 + $0x40] sm:$0xff] %vm2534_vm3, %v1544_v0 }
 0x1b0   : > { %v1527_v4 = vpop.permute.xlu1 %1526 }
 0x1b1   : > { %v1545_v5 = vsel %vm393_vm0, %v1011_v2, %v1527_v4  ;;  %v1529_v6 = vpop.permute.xlu0 %1528 }
 0x1b2   : > { %2544 = vst.msk [vmem:[%s3584_s6 + $0x48] sm:$0xff] %vm2534_vm3, %v1545_v5  ;;  %v1546_v7 = vsel %vm393_vm0, %v1012_v3, %v1529_v6 }
 0x1b3   : > { %2547 = vst.msk [vmem:[%s3584_s6 + $0x60] sm:$0xff] %vm2534_vm3, %v1546_v7 }
 0x1b4   : > { %v1531_v9 = vpop.permute.xlu1 %1530 }
 0x1b5   : > { %v1547_v10 = vsel %vm393_vm0, %v1013_v8, %v1531_v9 }
 0x1b6   : > { %2548 = vst.msk [vmem:[%s3584_s6 + $0x68] sm:$0xff] %vm2534_vm3, %v1547_v10 }
 0x1e4   : > { %v2505_v13 = vpop.permute.xlu1 %2504 }
 0x1e5   : > { %v2527_v14 = vsel %vm393_vm0, %v2017_v11, %v2505_v13  ;;  %v2503_v15 = vpop.permute.xlu0 %2502 }
 0x1e6   : > { %2538 = vst.msk [vmem:[%s3584_s6 + $0x18] sm:$0xff] %vm2534_vm3, %v2527_v14  ;;  %v2526_v16 = vsel %vm393_vm0, %v2016_v12, %v2503_v15 }
 0x1e7   : > { %2537 = vst.msk [vmem:[%s3584_s6 + $0x10] sm:$0xff] %vm2534_vm3, %v2526_v16 }
 0x1e8   : > { %v2509_v19 = vpop.permute.xlu1 %2508 }
 0x1e9   : > { %v2529_v20 = vsel %vm393_vm0, %v2019_v17, %v2509_v19  ;;  %v2507_v21 = vpop.permute.xlu0 %2506 }
 0x1ea   : > { %2542 = vst.msk [vmem:[%s3584_s6 + $0x38] sm:$0xff] %vm2534_vm3, %v2529_v20  ;;  %v2528_v22 = vsel %vm393_vm0, %v2018_v18, %v2507_v21 }
 0x1eb   : > { %2541 = vst.msk [vmem:[%s3584_s6 + $0x30] sm:$0xff] %vm2534_vm3, %v2528_v22 }
 0x1ec   : > { %v2513_v25 = vpop.permute.xlu1 %2512 }
 0x1ed   : > { %v2531_v26 = vsel %vm393_vm0, %v2021_v23, %v2513_v25  ;;  %v2511_v27 = vpop.permute.xlu0 %2510 }
 0x1ee   : > { %2546 = vst.msk [vmem:[%s3584_s6 + $0x58] sm:$0xff] %vm2534_vm3, %v2531_v26  ;;  %v2530_v28 = vsel %vm393_vm0, %v2020_v24, %v2511_v27 }
 0x1ef   : > { %2545 = vst.msk [vmem:[%s3584_s6 + $0x50] sm:$0xff] %vm2534_vm3, %v2530_v28 }
 0x1f0   : > { %v2517_v31 = vpop.permute.xlu1 %2516 }
 0x1f1   : > { %v2533_v32 = vsel %vm393_vm0, %v2023_v29, %v2517_v31  ;;  %v2515_v33 = vpop.permute.xlu0 %2514 }
 0x1f2   : > { %2550 = vst.msk [vmem:[%s3584_s6 + $0x78] sm:$0xff] %vm2534_vm3, %v2533_v32  ;;  %v2532_v34 = vsel %vm393_vm0, %v2022_v30, %v2515_v33 }
 0x1f3   : > { %2549 = vst.msk [vmem:[%s3584_s6 + $0x70] sm:$0xff] %vm2534_vm3, %v2532_v34 }
 0x1f4 PF: > { %s15_s22 = sadd.s32 1, %s3444_s22   ;;  %s4089_s7 = sld [smem:[#allocation3_spill]] }
 0x1f5   : > { %p12_p13 = scmp.ge.s32.totalorder %s15_s22, 10   ;;  %s4090_s18 = smov %s3436_s20 }
 0x1f6   : > { %s4091_s19 = smov %s3440_s21  ;;  %s4092_s20 = smov %s4095_s23 }
 0x1f7   :  { %14 = sbr.rel (!%p12_p13) target bundleno = 3 (0x3), region = 101 }
 0x1fa   : > { %s4093_s21 = smov %s4089_s7 }

</bundles_post_ra>
